<compile_context>
chip_gen: v7x
topology: tpu7x:2x2x1
jax: 0.10.0
libtpu: 0.0.40
codegen_flags: <defaults>
</compile_context>

<pallas_src>
import functools

import jax
import jax.numpy as jnp
from jax.experimental import pallas as pl
from jax.experimental.pallas import tpu as pltpu


def _round_up(x, m):
    return ((x + m - 1) // m) * m


def _make_kernel(num_critics, sub, nsub):
    """Fused multi-critic kernel for one batch tile of `nsub * sub` rows."""

    def kernel(s_ref, a_ref, w1s_ref, w1a_ref, b1_ref, w2_ref, b2_ref,
               w3_ref, b3_ref, o_ref):
        # Fully-unrolled sub-tile loop with static offsets (trace-equivalent to
        # lax.fori_loop(..., unroll=True)); keeps every slice aligned & static
        # and bounds h1/h2 live ranges to one (sub, H) tile each.
        for t in range(nsub):
            row0 = t * sub
            s = s_ref[pl.ds(row0, sub), :]
            a = a_ref[pl.ds(row0, sub), :]
            for c in range(num_critics):
                # Layer 1 (fused concat): h1 = [s; a] @ W1_c + b1_c, f32 accum.
                h1 = (jnp.dot(s, w1s_ref[c], preferred_element_type=jnp.float32)
                      + jnp.dot(a, w1a_ref[c], preferred_element_type=jnp.float32)
                      + b1_ref[c])
                h1 = jnp.maximum(h1, 0.0).astype(w2_ref.dtype)   # ReLU (f32) -> MXU dtype
                # Layer 2.
                h2 = (jnp.dot(h1, w2_ref[c], preferred_element_type=jnp.float32)
                      + b2_ref[c])
                h2 = jnp.maximum(h2, 0.0)
                # Layer 3 (H -> 1): VPU multiply + XLU lane reduction; store as a
                # lane-dense row of the (C, tb) output block.
                w3_row = w3_ref[c].astype(jnp.float32)            # (1, H)
                q = jnp.sum(h2 * w3_row, axis=-1) + b3_ref[c]     # (sub,) f32
                o_ref[c, pl.ds(row0, sub)] = q.astype(o_ref.dtype)

    return kernel


def critic_ensemble_forward(state, action, params, *, tile_b=512,
                            compute_dtype=jnp.bfloat16):
    """Fused forward for C critics sharing (state, action).

    params (leading critic axis C):
      w1s: (C, S, H)  w1a: (C, A, H)  b1: (C, 1, H)
      w2:  (C, H, H)  b2:  (C, 1, H)  w3: (C, 1, H)  b3: (C,)
    Returns q of shape (C, B) float32.
    """
    w1s, w1a, b1, w2, b2, w3, b3 = params
    B, S = state.shape
    A = action.shape[1]
    C, _, H = w2.shape

    # Streamed MXU operands in compute_dtype; biases / accumulation in f32.
    state = state.astype(compute_dtype)
    action = action.astype(compute_dtype)
    w1s = w1s.astype(compute_dtype)
    w1a = w1a.astype(compute_dtype)
    w2 = w2.astype(compute_dtype)
    w3 = w3.astype(compute_dtype)
    b1 = b1.astype(jnp.float32)
    b2 = b2.astype(jnp.float32)
    b3 = b3.astype(jnp.float32)

    # ---- Batch tiling -------------------------------------------------------
    # Small batches: one full-extent tile (full-dim blocks need no alignment).
    # Large batches: lane-aligned tiles capped at tile_b, sized for >=2 grid
    # steps so both v7x TensorCores get work (perf-neutral on v5e/v6e).
    if B <= 256:
        tb = B
    else:
        tb = min(tile_b, _round_up(-(-B // 2), 128))
        tb = max(tb, 128)
    Bp = _round_up(B, tb)
    if Bp != B:
        pad = Bp - B
        state = jnp.pad(state, ((0, pad), (0, 0)))
        action = jnp.pad(action, ((0, pad), (0, 0)))
    grid = (Bp // tb,)

    # Sub-tile rows so (sub, H) f32 activations stay within the vreg file.
    sub = 128 if (tb > 128 and tb % 128 == 0) else tb
    nsub = tb // sub

    resident3 = lambda i: (0, 0, 0)   # weights/biases: same block every step

    flops = int(2 * C * Bp * ((S + A) * H + H * H + H))
    bytes_accessed = int(
        state.size * state.dtype.itemsize
        + action.size * action.dtype.itemsize
        + sum(int(x.size) * x.dtype.itemsize
              for x in (w1s, w1a, b1, w2, b2, w3, b3))
        + C * Bp * 4)

    q = pl.pallas_call(
        _make_kernel(C, sub, nsub),
        out_shape=jax.ShapeDtypeStruct((C, Bp), jnp.float32),
        grid_spec=pltpu.PrefetchScalarGridSpec(
            num_scalar_prefetch=0,
            grid=grid,
            in_specs=[
                pl.BlockSpec((tb, S), lambda i: (i, 0)),   # state  (streamed)
                pl.BlockSpec((tb, A), lambda i: (i, 0)),   # action (streamed)
                pl.BlockSpec((C, S, H), resident3),        # W1[:S] (resident)
                pl.BlockSpec((C, A, H), resident3),        # W1[S:]
                pl.BlockSpec((C, 1, H), resident3),        # b1 (f32)
                pl.BlockSpec((C, H, H), resident3),        # W2
                pl.BlockSpec((C, 1, H), resident3),        # b2 (f32)
                pl.BlockSpec((C, 1, H), resident3),        # W3 rows
                pl.BlockSpec(memory_space=pltpu.SMEM),     # b3 scalars (SMEM)
            ],
            out_specs=pl.BlockSpec((C, tb), lambda i: (0, i)),  # lane-dense
        ),
        compiler_params=pltpu.CompilerParams(
            dimension_semantics=("parallel",),
            vmem_limit_bytes=32 * 1024 * 1024,
        ),
        cost_estimate=pl.CostEstimate(flops=flops, transcendentals=0,
                                      bytes_accessed=bytes_accessed),
    )(state, action, w1s, w1a, b1, w2, b2, w3, b3)

    return q[:, :B]


def critic_action_value(state, action, params, *, tile_b=512,
                        compute_dtype=jnp.bfloat16):
    """Single-critic forward matching the PyTorch module: returns (B, 1) f32."""
    q = critic_ensemble_forward(state, action, params, tile_b=tile_b,
                                compute_dtype=compute_dtype)
    return q[0][:, None]


def init_params(key, state_dims, hidden_dim, action_dims, num_critics=1):
    """PyTorch nn.Linear-style U(-1/sqrt(fan_in), 1/sqrt(fan_in)) init (f32).

    Returns params with a leading critic axis C so twin critics / target
    copies can be fused into a single pallas_call.  W1 is split into
    state/action halves, W3 is stored as a (1, H) row, b3 as a scalar.
    """
    def linear(k, fan_in, fan_out):
        kw, kb = jax.random.split(k)
        bound = 1.0 / jnp.sqrt(jnp.float32(fan_in))
        w = jax.random.uniform(kw, (fan_in, fan_out), jnp.float32, -bound, bound)
        b = jax.random.uniform(kb, (1, fan_out), jnp.float32, -bound, bound)
        return w, b

    w1s_l, w1a_l, b1_l, w2_l, b2_l, w3_l, b3_l = [], [], [], [], [], [], []
    for kc in jax.random.split(key, num_critics):
        k1, k2, k3 = jax.random.split(kc, 3)
        w1, b1 = linear(k1, state_dims + action_dims, hidden_dim)
        w2, b2 = linear(k2, hidden_dim, hidden_dim)
        w3, b3 = linear(k3, hidden_dim, 1)
        w1s_l.append(w1[:state_dims])
        w1a_l.append(w1[state_dims:])
        b1_l.append(b1)
        w2_l.append(w2)
        b2_l.append(b2)
        w3_l.append(w3.T)          # (1, H) row
        b3_l.append(b3[0, 0])      # scalar
    stack = lambda xs: jnp.stack(xs, axis=0)
    return (stack(w1s_l), stack(w1a_l), stack(b1_l), stack(w2_l),
            stack(b2_l), stack(w3_l), jnp.stack(b3_l))


def reference_forward(state, action, params, compute_dtype):
    """Pure-JAX reference following the same dtype path; returns (C, B) f32."""
    w1s, w1a, b1, w2, b2, w3, b3 = params
    s = state.astype(compute_dtype)
    a = action.astype(compute_dtype)
    h1 = (jnp.einsum('bs,csh->cbh', s, w1s.astype(compute_dtype),
                     preferred_element_type=jnp.float32)
          + jnp.einsum('ba,cah->cbh', a, w1a.astype(compute_dtype),
                       preferred_element_type=jnp.float32)
          + b1.astype(jnp.float32))
    h1 = jnp.maximum(h1, 0.0).astype(compute_dtype)
    h2 = jnp.einsum('cbh,chk->cbk', h1, w2.astype(compute_dtype),
                    preferred_element_type=jnp.float32) + b2.astype(jnp.float32)
    h2 = jnp.maximum(h2, 0.0)
    q = jnp.sum(h2 * w3.astype(jnp.float32), axis=-1) + b3.astype(jnp.float32)[:, None]
    return q


if __name__ == "__main__":
    # Small shapes consistent with HalfCheetah-v5: state=17, action=6.
    batch, state_dims, hidden_dim, action_dims = 64, 17, 32, 6

    key = jax.random.PRNGKey(0)
    kp1, kp2, ks, ka = jax.random.split(key, 4)
    state = jax.random.normal(ks, (batch, state_dims), jnp.float32)
    action = jax.random.normal(ka, (batch, action_dims), jnp.float32)

    # 1) Single critic (exact module semantics), f32 path: tight numeric check.
    params1 = init_params(kp1, state_dims, hidden_dim, action_dims, num_critics=1)
    fwd_f32 = jax.jit(functools.partial(critic_action_value,
                                        compute_dtype=jnp.float32))
    q_f32 = jax.block_until_ready(fwd_f32(state, action, params1))
    q_f32_ref = reference_forward(state, action, params1, jnp.float32)[0][:, None]
    assert q_f32.shape == (batch, 1)
    assert jnp.allclose(q_f32, q_f32_ref, atol=5e-3, rtol=5e-3), \
        float(jnp.max(jnp.abs(q_f32 - q_f32_ref)))

    # 2) Fused twin critics (Q1, Q2 in one pallas_call), default bf16 perf path.
    params2 = init_params(kp2, state_dims, hidden_dim, action_dims, num_critics=2)
    fwd_twin = jax.jit(functools.partial(critic_ensemble_forward,
                                         compute_dtype=jnp.bfloat16))
    q_twin = jax.block_until_ready(fwd_twin(state, action, params2))
    q_twin_ref = reference_forward(state, action, params2, jnp.bfloat16)
    assert q_twin.shape == (2, batch)
    assert jnp.allclose(q_twin, q_twin_ref, atol=5e-2, rtol=5e-2), \
        float(jnp.max(jnp.abs(q_twin - q_twin_ref)))

    # 3) Multi-tile + padded-batch path (exercises the batch grid, sub-tiling
    #    and the lane-aligned sub-tile stores).
    big_b = 800  # > 256 -> tb = 512, Bp = 1024 (padded), grid = (2,), 4 sub-tiles
    sb = jax.random.normal(ks, (big_b, state_dims), jnp.float32)
    ab = jax.random.normal(ka, (big_b, action_dims), jnp.float32)
    q_big = jax.block_until_ready(
        jax.jit(functools.partial(critic_ensemble_forward,
                                  compute_dtype=jnp.bfloat16))(sb, ab, params2))
    q_big_ref = reference_forward(sb, ab, params2, jnp.bfloat16)
    assert q_big.shape == (2, big_b)
    assert jnp.allclose(q_big, q_big_ref, atol=5e-2, rtol=5e-2), \
        float(jnp.max(jnp.abs(q_big - q_big_ref)))

    print("KERNEL_OK")
</pallas_src>

<mosaic_0001>
module attributes {stable_mosaic.version = 11 : i64} {
  func.func @kernel(%arg0: i32, %arg1: memref<64x17xf32, #tpu.memory_space<vmem>>, %arg2: memref<64x6xf32, #tpu.memory_space<vmem>>, %arg3: memref<1x17x32xf32, #tpu.memory_space<vmem>>, %arg4: memref<1x6x32xf32, #tpu.memory_space<vmem>>, %arg5: memref<1x1x32xf32, #tpu.memory_space<vmem>>, %arg6: memref<1x32x32xf32, #tpu.memory_space<vmem>>, %arg7: memref<1x1x32xf32, #tpu.memory_space<vmem>>, %arg8: memref<1x1x32xf32, #tpu.memory_space<vmem>>, %arg9: memref<1xf32, #tpu.memory_space<smem>>, %arg10: memref<1x64xf32, #tpu.memory_space<vmem>>) attributes {dimension_semantics = [#tpu.dimension_semantics<parallel>], iteration_bounds = array<i64: 1>, scalar_prefetch = 0 : i64, scratch_operands = 0 : i64, tpu.core_type = #tpu.core_type<tc>, window_params = [{transform_indices = @transform_0, window_bounds = array<i64: 64, 17>}, {transform_indices = @transform_1, window_bounds = array<i64: 64, 6>}, {pipeline_mode = #tpu.pipeline_mode<synchronous>, transform_indices = @transform_2, window_bounds = array<i64: 1, 17, 32>}, {pipeline_mode = #tpu.pipeline_mode<synchronous>, transform_indices = @transform_3, window_bounds = array<i64: 1, 6, 32>}, {pipeline_mode = #tpu.pipeline_mode<synchronous>, transform_indices = @transform_4, window_bounds = array<i64: 1, 1, 32>}, {pipeline_mode = #tpu.pipeline_mode<synchronous>, transform_indices = @transform_5, window_bounds = array<i64: 1, 32, 32>}, {pipeline_mode = #tpu.pipeline_mode<synchronous>, transform_indices = @transform_6, window_bounds = array<i64: 1, 1, 32>}, {pipeline_mode = #tpu.pipeline_mode<synchronous>, transform_indices = @transform_7, window_bounds = array<i64: 1, 1, 32>}, {transform_indices = @transform_8, window_bounds = array<i64: 1>}, {transform_indices = @transform_9, window_bounds = array<i64: 1, 64>}]} {
    %c0 = arith.constant 0 : index
    %c0_0 = arith.constant 0 : index
    %0 = vector.load %arg1[%c0, %c0_0] : memref<64x17xf32, #tpu.memory_space<vmem>>, vector<64x17xf32>
    %c0_1 = arith.constant 0 : index
    %c0_2 = arith.constant 0 : index
    %1 = vector.load %arg2[%c0_1, %c0_2] : memref<64x6xf32, #tpu.memory_space<vmem>>, vector<64x6xf32>
    %c0_3 = arith.constant 0 : index
    %c0_4 = arith.constant 0 : index
    %c0_5 = arith.constant 0 : index
    %2 = vector.load %arg3[%c0_3, %c0_4, %c0_5] : memref<1x17x32xf32, #tpu.memory_space<vmem>>, vector<1x17x32xf32>
    %3 = vector.shape_cast %2 : vector<1x17x32xf32> to vector<17x32xf32>
    %cst = arith.constant dense<0.000000e+00> : vector<64x32xf32>
    %4 = tpu.matmul %0, %3, %cst {dimension_numbers = #tpu.dot_dimension_numbers<[1], [0], [0], [1], [0, 0, 1, 1], [], []>} : vector<64x17xf32>, vector<17x32xf32>, vector<64x32xf32> -> vector<64x32xf32>
    %c0_6 = arith.constant 0 : index
    %c0_7 = arith.constant 0 : index
    %c0_8 = arith.constant 0 : index
    %5 = vector.load %arg4[%c0_6, %c0_7, %c0_8] : memref<1x6x32xf32, #tpu.memory_space<vmem>>, vector<1x6x32xf32>
    %6 = vector.shape_cast %5 : vector<1x6x32xf32> to vector<6x32xf32>
    %cst_9 = arith.constant dense<0.000000e+00> : vector<64x32xf32>
    %7 = tpu.matmul %1, %6, %cst_9 {dimension_numbers = #tpu.dot_dimension_numbers<[1], [0], [0], [1], [0, 0, 1, 1], [], []>} : vector<64x6xf32>, vector<6x32xf32>, vector<64x32xf32> -> vector<64x32xf32>
    %8 = arith.addf %4, %7 : vector<64x32xf32>
    %c0_10 = arith.constant 0 : index
    %c0_11 = arith.constant 0 : index
    %c0_12 = arith.constant 0 : index
    %9 = vector.load %arg5[%c0_10, %c0_11, %c0_12] : memref<1x1x32xf32, #tpu.memory_space<vmem>>, vector<1x1x32xf32>
    %10 = vector.shape_cast %9 : vector<1x1x32xf32> to vector<1x32xf32>
    %11 = vector.broadcast %10 : vector<1x32xf32> to vector<64x32xf32>
    %12 = arith.addf %8, %11 : vector<64x32xf32>
    %cst_13 = arith.constant 0.000000e+00 : f32
    %13 = vector.broadcast %cst_13 : f32 to vector<64x32xf32>
    %14 = arith.maximumf %12, %13 : vector<64x32xf32>
    %c0_14 = arith.constant 0 : index
    %c0_15 = arith.constant 0 : index
    %c0_16 = arith.constant 0 : index
    %15 = vector.load %arg6[%c0_14, %c0_15, %c0_16] : memref<1x32x32xf32, #tpu.memory_space<vmem>>, vector<1x32x32xf32>
    %16 = vector.shape_cast %15 : vector<1x32x32xf32> to vector<32x32xf32>
    %cst_17 = arith.constant dense<0.000000e+00> : vector<64x32xf32>
    %17 = tpu.matmul %14, %16, %cst_17 {dimension_numbers = #tpu.dot_dimension_numbers<[1], [0], [0], [1], [0, 0, 1, 1], [], []>} : vector<64x32xf32>, vector<32x32xf32>, vector<64x32xf32> -> vector<64x32xf32>
    %c0_18 = arith.constant 0 : index
    %c0_19 = arith.constant 0 : index
    %c0_20 = arith.constant 0 : index
    %18 = vector.load %arg7[%c0_18, %c0_19, %c0_20] : memref<1x1x32xf32, #tpu.memory_space<vmem>>, vector<1x1x32xf32>
    %19 = vector.shape_cast %18 : vector<1x1x32xf32> to vector<1x32xf32>
    %20 = vector.broadcast %19 : vector<1x32xf32> to vector<64x32xf32>
    %21 = arith.addf %17, %20 : vector<64x32xf32>
    %cst_21 = arith.constant 0.000000e+00 : f32
    %22 = vector.broadcast %cst_21 : f32 to vector<64x32xf32>
    %23 = arith.maximumf %21, %22 : vector<64x32xf32>
    %c0_22 = arith.constant 0 : index
    %c0_23 = arith.constant 0 : index
    %c0_24 = arith.constant 0 : index
    %24 = vector.load %arg8[%c0_22, %c0_23, %c0_24] : memref<1x1x32xf32, #tpu.memory_space<vmem>>, vector<1x1x32xf32>
    %25 = vector.shape_cast %24 : vector<1x1x32xf32> to vector<1x32xf32>
    %26 = vector.broadcast %25 : vector<1x32xf32> to vector<64x32xf32>
    %27 = arith.mulf %23, %26 : vector<64x32xf32>
    %cst_25 = arith.constant dense<0.000000e+00> : vector<64xf32>
    %28 = vector.multi_reduction <add>, %27, %cst_25 [1] : vector<64x32xf32> to vector<64xf32>
    %c0_26 = arith.constant 0 : index
    %29 = memref.load %arg9[%c0_26] : memref<1xf32, #tpu.memory_space<smem>>
    %30 = vector.broadcast %29 : f32 to vector<64xf32>
    %31 = arith.addf %28, %30 : vector<64xf32>
    %c0_27 = arith.constant 0 : index
    %c0_28 = arith.constant 0 : index
    %32 = vector.load %arg10[%c0_27, %c0_28] : memref<1x64xf32, #tpu.memory_space<vmem>>, vector<1x64xf32>
    %33 = vector.shape_cast %32 : vector<1x64xf32> to vector<64xf32>
    %34 = vector.shape_cast %31 : vector<64xf32> to vector<1x64xf32>
    tpu.vector_store %arg10[%c0_27, %c0_28], %34 {strides = array<i32>} : memref<1x64xf32, #tpu.memory_space<vmem>>, vector<1x64xf32>,
    return
  }
  func.func @transform_0(%arg0: i32) -> (i32, i32) {
    %c0_i32 = arith.constant 0 : i32
    %c0_i32_0 = arith.constant 0 : i32
    return %arg0, %c0_i32 : i32, i32
  }
  func.func @transform_1(%arg0: i32) -> (i32, i32) {
    %c0_i32 = arith.constant 0 : i32
    %c0_i32_0 = arith.constant 0 : i32
    return %arg0, %c0_i32 : i32, i32
  }
  func.func @transform_2(%arg0: i32) -> (i32, i32, i32) {
    %c0_i32 = arith.constant 0 : i32
    %c0_i32_0 = arith.constant 0 : i32
    %c0_i32_1 = arith.constant 0 : i32
    %c0_i32_2 = arith.constant 0 : i32
    return %c0_i32, %c0_i32_0, %c0_i32_1 : i32, i32, i32
  }
  func.func @transform_3(%arg0: i32) -> (i32, i32, i32) {
    %c0_i32 = arith.constant 0 : i32
    %c0_i32_0 = arith.constant 0 : i32
    %c0_i32_1 = arith.constant 0 : i32
    %c0_i32_2 = arith.constant 0 : i32
    return %c0_i32, %c0_i32_0, %c0_i32_1 : i32, i32, i32
  }
  func.func @transform_4(%arg0: i32) -> (i32, i32, i32) {
    %c0_i32 = arith.constant 0 : i32
    %c0_i32_0 = arith.constant 0 : i32
    %c0_i32_1 = arith.constant 0 : i32
    %c0_i32_2 = arith.constant 0 : i32
    return %c0_i32, %c0_i32_0, %c0_i32_1 : i32, i32, i32
  }
  func.func @transform_5(%arg0: i32) -> (i32, i32, i32) {
    %c0_i32 = arith.constant 0 : i32
    %c0_i32_0 = arith.constant 0 : i32
    %c0_i32_1 = arith.constant 0 : i32
    %c0_i32_2 = arith.constant 0 : i32
    return %c0_i32, %c0_i32_0, %c0_i32_1 : i32, i32, i32
  }
  func.func @transform_6(%arg0: i32) -> (i32, i32, i32) {
    %c0_i32 = arith.constant 0 : i32
    %c0_i32_0 = arith.constant 0 : i32
    %c0_i32_1 = arith.constant 0 : i32
    %c0_i32_2 = arith.constant 0 : i32
    return %c0_i32, %c0_i32_0, %c0_i32_1 : i32, i32, i32
  }
  func.func @transform_7(%arg0: i32) -> (i32, i32, i32) {
    %c0_i32 = arith.constant 0 : i32
    %c0_i32_0 = arith.constant 0 : i32
    %c0_i32_1 = arith.constant 0 : i32
    %c0_i32_2 = arith.constant 0 : i32
    return %c0_i32, %c0_i32_0, %c0_i32_1 : i32, i32, i32
  }
  func.func @transform_8(%arg0: i32) -> i32 {
    %c0_i32 = arith.constant 0 : i32
    %c0_i32_0 = arith.constant 0 : i32
    return %c0_i32 : i32
  }
  func.func @transform_9(%arg0: i32) -> (i32, i32) {
    %c0_i32 = arith.constant 0 : i32
    %c0_i32_0 = arith.constant 0 : i32
    return %c0_i32, %arg0 : i32, i32
  }
}

</mosaic_0001>

<bundles_post_ra>
// kernel: critic_action_value.1
= control target key start
LH: loop header
LB: loop body
LE: loop exit
PB: predicated region body
PF: predicated region fallthrough
CT: control target
= control target key end

     0   :  { %vm79_vm0 = vcmask 1045504   ;;  %vm54_vm1 = vcmask 48128   ;;  %vm213_vm2 = vcmask 1040384   ;;  %vm188_vm3 = vcmask 138240   ;;  %s964_s0 = inlined_call_operand.vmem [shape: f32[64,17], index: 0, kind: input, shape index: {}]   ;;  %s965_s1 = inlined_call_operand.vmem [shape: f32[64,6], index: 1, kind: input, shape index: {}]   ;;  %s966_s2 = inlined_call_operand.vmem [shape: f32[1,17,32], index: 2, kind: input, shape index: {}]   ;;  %s967_s3 = inlined_call_operand.vmem [shape: f32[1,6,32], index: 3, kind: input, shape index: {}]   ;;  %s968_s4 = inlined_call_operand.vmem [shape: f32[1,1,32], index: 4, kind: input, shape index: {}]   ;;  %s969_s5 = inlined_call_operand.vmem [shape: f32[1,32,32], index: 5, kind: input, shape index: {}]   ;;  %s970_s6 = inlined_call_operand.vmem [shape: f32[1,1,32], index: 6, kind: input, shape index: {}]   ;;  %s971_s7 = inlined_call_operand.vmem [shape: f32[1,1,32], index: 7, kind: input, shape index: {}]   ;;  %s972_s8 = inlined_call_operand.<no memory space> [shape: f32[1], index: 8, kind: input, shape index: {}]   ;;  %s973_s9 = inlined_call_operand.hbm [shape: f32[1,64], index: 9, kind: output, shape index: {}]  }
   0x1   :  { %v53_v0 = vld [vmem:[%s967_s3] sm:$0x3f]  ;;  %v43_v2 = vld [vmem:[%s965_s1 + $0x8] sm:$0xff]  ;;  %v44_v5 = vld [vmem:[%s965_s1 + $0x10] sm:$0xff] }
   0x2   :  { %v42_v1 = vld [vmem:[%s965_s1] sm:$0xff]  ;;  %684 = vmatprep.subr.msk.mxu0 %vm79_vm0, %v53_v0  ;;  %v51_v4 = vld [vmem:[%s966_s2 + $0x8] sm:$0xff]  ;;  %748 = vmatprep.subr.msk.mxu1 %vm79_vm0, %v53_v0  ;;  %v52_v7 = vld [vmem:[%s966_s2 + $0x10] sm:$0x1] }
   0x3   :  { %686 = vmatprep.mubr.msk.f32.mxu0 %vm54_vm1, %v42_v1  ;;  %v50_v3 = vld [vmem:[%s966_s2] sm:$0xff]  ;;  %685 = vmatpush3.msk.msra.mxu0 %vm79_vm0, %v53_v0  ;;  %v45_v8 = vld [vmem:[%s965_s1 + $0x18] sm:$0xff]  ;;  %v47_v10 = vld [vmem:[%s965_s1 + $0x28] sm:$0xff] }
   0x4   :  { %v736_v6 = vpack.c.bf16 %v51_v4, %v50_v3  ;;  %687 = vmatmul.mubr.msk.f32.vlgmr.msra.gmra.mrb[0].mxu0 %vm54_vm1, %v43_v2  ;;  %749 = vmatpush3.msk.msra.mxu1 %vm79_vm0, %v53_v0  ;;  %v46_v9 = vld [vmem:[%s965_s1 + $0x20] sm:$0xff]  ;;  %v48_v12 = vld [vmem:[%s965_s1 + $0x30] sm:$0xff]  ;;  %v49_v14 = vld [vmem:[%s965_s1 + $0x38] sm:$0xff] }
   0x5   :  { %689 = vmatprep.mubr.msk.f32.mxu0 %vm54_vm1, %v44_v5  ;;  %v34_v11 = vld [vmem:[%s964_s0] sm:$0xff]  ;;  %692 = vmatprep.mubr.msk.f32.mxu1 %vm54_vm1, %v46_v9  ;;  %v346_v15 = vld [vmem:[%s969_s5 + $0x8] sm:$0xff] }
   0x6   :  { %737 = vmatprep.subr.bf16.mxu0 %v736_v6  ;;  %693 = vmatmul.mubr.msk.f32.vlgmr.msra.gmra.mrb[0].mxu1 %vm54_vm1, %v47_v10  ;;  %v345_v13 = vld [vmem:[%s969_s5] sm:$0xff] }
   0x7   :  { %739 = vmatpush3.bf16.msra.mxu0 %v736_v6  ;;  %695 = vmatprep.mubr.msk.f32.mxu1 %vm54_vm1, %v48_v12 }
   0x8   :  { %702 = vmatprep.subr.msk.mxu0 %vm213_vm2, %v52_v7  ;;  %690 = vmatmul.mubr.msk.f32.gmra.mrb[2].mxu0 %vm54_vm1, %v45_v8 }
   0x9   :  { %15 = vsyncpa [#allocation4], 0  ;;  %704 = vmatprep.mubr.msk.f32.mxu0 %vm188_vm3, %v34_v11  ;;  %v35_v16 = vld [vmem:[%s964_s0 + $0x8] sm:$0xff]  ;;  %v740_v17 = vpack.c.bf16 %v346_v15, %v345_v13  ;;  %v36_v18 = vld [vmem:[%s964_s0 + $0x10] sm:$0xff]  ;;  %vm356_vm4 = vcmask 261120   ;;  %vm562_vm5 = vcmask 130112  }
   0xa   :  { %696 = vmatmul.mubr.msk.f32.gmra.mrb[2].mxu1 %vm54_vm1, %v49_v14  ;;  %v37_v19 = vld [vmem:[%s964_s0 + $0x18] sm:$0xff]  ;;  %v38_v20 = vld [vmem:[%s964_s0 + $0x20] sm:$0xff]  ;;  %v39_v21 = vld [vmem:[%s964_s0 + $0x28] sm:$0xff]  ;;  %vm569_vm6 = vcmask 195712   ;;  %vm576_vm7 = vcmask 261312   ;;  %vm583_vm8 = vcmask 326912  }
   0xb   :  { %703 = vmatpush3.msk.msra.mxu0 %vm213_vm2, %v52_v7  ;;  %741 = vmatprep.subr.bf16.mxu1 %v740_v17  ;;  %v40_v22 = vld [vmem:[%s964_s0 + $0x30] sm:$0xff]  ;;  %v41_v23 = vld [vmem:[%s964_s0 + $0x38] sm:$0xff]  ;;  %v641_v29 = vld [vmem:[%s968_s4] ss:$0 sm:$0xff]  ;;  %vm590_vm9 = vcmask 392512   ;;  %vm597_vm10 = vcmask 458112  }
   0xc   :  { %705 = vmatmul.mubr.msk.f32.vlgmr.msra.gmra.mrb[0].mxu0 %vm188_vm3, %v35_v16  ;;  %743 = vmatpush3.bf16.msra.mxu1 %v740_v17  ;;  %v347_v24 = vld [vmem:[%s969_s5 + $0x10] sm:$0xff]  ;;  %v348_v25 = vld [vmem:[%s969_s5 + $0x18] sm:$0xff]  ;;  %v642_v60 = vld [vmem:[%s970_s6] ss:$0 sm:$0xff]  ;;  %vm604_vm11 = vcmask 523712   ;;  %vm607_vm12 = vcmask 516096  }
   0xd   :  { %707 = vmatprep.mubr.msk.f32.mxu0 %vm188_vm3, %v36_v18  ;;  %v744_v26 = vpack.c.bf16 %v348_v25, %v347_v24  ;;  %v651_v1 = vld [vmem:[%s971_s7] ss:$0 sm:$0xff] }
   0xf   :  { %745 = vmatprep.subr.bf16.mxu1 %v744_v26 }
  0x10   :  { %708 = vmatmul.mubr.msk.f32.gmra.mrb[2].mxu0 %vm188_vm3, %v37_v19  ;;  %747 = vmatpush3.bf16.msra.mxu1 %v744_v26 }
  0x11   :  { %710 = vmatprep.mubr.msk.f32.mxu0 %vm188_vm3, %v38_v20 }
  0x14   :  { %711 = vmatmul.mubr.msk.f32.gmra.mrb[4].mxu0 %vm188_vm3, %v39_v21 }
  0x15   :  { %713 = vmatprep.mubr.msk.f32.mxu0 %vm188_vm3, %v40_v22 }
  0x18   :  { %714 = vmatmul.mubr.msk.f32.gmra.mrb[6].mxu0 %vm188_vm3, %v41_v23 }
  0xd9   :  { %v694_v27 = vpop.f32.mrb[0].mxu1 }
  0xda   :  { %v169_v28 = vpop.f32.mrb[1].mxu1 }
  0xdd   :  { %v697_v30 = vpop.f32.mrb[2].mxu1 }
  0xde   :  { %v179_v32 = vpop.f32.mrb[3].mxu1 }
  0xdf   :  { %v706_v31 = vpop.f32.mrb[0].mxu0 }
  0xe0   :  { %v330_v33 = vadd.f32 %v706_v31, %v641_v29  ;;  %v283_v34 = vpop.f32.mrb[1].mxu0 }
  0xe1   :  { %v329_v35 = vadd.f32 %v641_v29, %v283_v34 }
  0xe2   :  { %v338_v38 = vmax.f32 %v330_v33, 0.0 }
  0xe3   :  { %v337_v36 = vmax.f32 %v329_v35, 0.0  ;;  %v709_v37 = vpop.f32.mrb[2].mxu0 }
  0xe4   :  { %v332_v39 = vadd.f32 %v709_v37, %v641_v29  ;;  %v293_v40 = vpop.f32.mrb[3].mxu0 }
  0xe5   :  { %v331_v41 = vadd.f32 %v641_v29, %v293_v40  ;;  %724 = vmatprep.mubr.msk.f32.mxu1 %vm356_vm4, %v337_v36 }
  0xe6   :  { %725 = vmatmul.mubr.msk.f32.vlgmr.msra.gmra.mrb[4].mxu1 %vm356_vm4, %v338_v38  ;;  %v340_v44 = vmax.f32 %v332_v39, 0.0  ;;  %v551_v38 = vlaneseq }
  0xe7   :  { %v339_v42 = vmax.f32 %v331_v41, 0.0  ;;  %v712_v43 = vpop.f32.mrb[4].mxu0 }
  0xe8   :  { %v309_v45 = vadd.f32 %v712_v43, %v694_v27  ;;  %v303_v46 = vpop.f32.mrb[5].mxu0  ;;  %v552_v39 = vand.u32 127, %v551_v38  ;;  %v554_v41 = vshrl.u32 %v551_v38, 7  ;;  %v534_v43 = vstv %s972_s8  ;;  %s783_s8 = smov [#allocation3]  }
  0xe9   :  { %v304_v47 = vadd.f32 %v303_v46, %v169_v28  ;;  %727 = vmatprep.mubr.msk.f32.mxu1 %vm356_vm4, %v339_v42  ;;  %s615_s13 = sshll.u32 %s783_s8, 4  ;;  %s616_s13 = int_to_ptr.vmem [resolvable:$true] %s615_s13 }
  0xea   :  { %v334_v48 = vadd.f32 %v641_v29, %v309_v45  ;;  %728 = vmatmul.mubr.msk.f32.gmra.mrb[6].mxu1 %vm356_vm4, %v340_v44  ;;  %v557_v42 = vadd.s32 4294967288, %v552_v39  ;;  %v564_v44 = vadd.s32 4294967280, %v552_v39  ;;  %v555_v45 = vsub.s32 %v552_v39, %v554_v41  ;;  %s759_s14 = scalar_lea.vmem %s616_s13, 16  ;;  %s763_s15 = scalar_lea.vmem %s616_s13, 32 }
  0xeb   :  { %v333_v49 = vadd.f32 %v641_v29, %v304_v47  ;;  %v715_v50 = vpop.f32.mrb[6].mxu0  ;;  %v571_v47 = vadd.s32 4294967272, %v552_v39  ;;  %p760_p0 = scmp.ne.s32.totalorder %s616_s13, %s759_s14  ;;  %p764_p1 = scmp.lt.s32.totalorder %s616_s13, %s616_s13 }
  0xec   :  { %v319_v51 = vadd.f32 %v715_v50, %v697_v30  ;;  %v313_v52 = vpop.f32.mrb[7].mxu0  ;;  %v342_v55 = vmax.f32 %v334_v48, 0.0  ;;  %v560_v50 = vsub.s32 %v557_v42, %v554_v41  ;;  %p765_p2 = scmp.lt.s32.totalorder %s763_s15, %s759_s14 }
  0xed   :  { %v341_v53 = vmax.f32 %v333_v49, 0.0  ;;  %v314_v54 = vadd.f32 %v313_v52, %v179_v32  ;;  %v578_v52 = vadd.s32 4294967264, %v552_v39 }
  0xee   :  { %v336_v56 = vadd.f32 %v641_v29, %v319_v51  ;;  %p766_p3 = por %p765_p2, %p764_p1 }
  0xef   :  { %v335_v57 = vadd.f32 %v641_v29, %v314_v54  ;;  %730 = vmatprep.mubr.msk.f32.mxu1 %vm356_vm4, %v341_v53  ;;  %v567_v53 = vsub.s32 %v564_v44, %v554_v41  ;;  %v585_v54 = vadd.s32 4294967256, %v552_v39 }
  0xf0   :  { %731 = vmatmul.mubr.msk.f32.gmra.mrb[8].mxu1 %vm356_vm4, %v342_v55  ;;  %v344_v59 = vmax.f32 %v336_v56, 0.0  ;;  %v574_v56 = vsub.s32 %v571_v47, %v554_v41  ;;  %p767_p4 = pnand %p766_p3, %p760_p0 }
  0xf1   :  { %v343_v58 = vmax.f32 %v335_v57, 0.0 }
  0xf3   :  { %733 = vmatprep.mubr.msk.f32.mxu1 %vm356_vm4, %v343_v58 }
  0xf4   :  { %734 = vmatmul.mubr.msk.f32.gmra.mrb[10].mxu1 %vm356_vm4, %v344_v59 }
 0x1b9   :  { %v726_v61 = vpop.f32.mrb[4].mxu1 }
 0x1ba   :  { %v453_v62 = vadd.f32 %v726_v61, %v642_v60  ;;  %v447_v63 = vpop.f32.mrb[5].mxu1  ;;  %v581_v61 = vsub.s32 %v578_v52, %v554_v41 }
 0x1bb   :  { %v448_v0 = vadd.f32 %v642_v60, %v447_v63 }
 0x1bc   :  { %v487_v2 = vmax.f32 %v453_v62, 0.0  ;;  %v592_v62 = vadd.s32 4294967248, %v552_v39 }
 0x1bd   :  { %v486_v3 = vmax.f32 %v448_v0, 0.0  ;;  %v729_v4 = vpop.f32.mrb[6].mxu1 }
 0x1be   :  { %v463_v5 = vadd.f32 %v729_v4, %v642_v60  ;;  %v457_v6 = vpop.f32.mrb[7].mxu1  ;;  %v502_v7 = vmul.f32 %v651_v1, %v487_v2  ;;  %v599_v2 = vadd.s32 4294967240, %v552_v39 }
 0x1bf   :  { %v458_v8 = vadd.f32 %v642_v60, %v457_v6  ;;  %v501_v11 = vmul.f32 %v651_v1, %v486_v3 }
 0x1c0   :  { %v489_v9 = vmax.f32 %v463_v5, 0.0  ;;  %v512_v10 = vsel %vm356_vm4, %v502_v7, 0.0 }
 0x1c1   :  { %v488_v12 = vmax.f32 %v458_v8, 0.0  ;;  %513 = vadd.xlane.f32.xlu0 %v512_v10  ;;  %v509_v17 = vsel %vm356_vm4, %v501_v11, 0.0  ;;  %v595_v11 = vsub.s32 %v592_v62, %v554_v41 }
 0x1c2   :  { %v504_v13 = vmul.f32 %v651_v1, %v489_v9 }
 0x1c3   :  { %v732_v14 = vpop.f32.mrb[8].mxu1  ;;  %v503_v19 = vmul.f32 %v651_v1, %v488_v12 }
 0x1c4   :  { %v473_v15 = vadd.f32 %v732_v14, %v642_v60  ;;  %v467_v16 = vpop.f32.mrb[9].mxu1  ;;  %v518_v18 = vsel %vm356_vm4, %v504_v13, 0.0  ;;  %v602_v14 = vsub.s32 %v599_v2, %v554_v41 }
 0x1c5   :  { %v468_v20 = vadd.f32 %v642_v60, %v467_v16  ;;  %510 = vadd.xlane.f32.xlu0 %v509_v17  ;;  %519 = vadd.xlane.f32.xlu1 %v518_v18  ;;  %v515_v26 = vsel %vm356_vm4, %v503_v19, 0.0 }
 0x1c6   :  { %v491_v21 = vmax.f32 %v473_v15, 0.0 }
 0x1c7   :  { %v490_v22 = vmax.f32 %v468_v20, 0.0  ;;  %v735_v23 = vpop.f32.mrb[10].mxu1 }
 0x1c8   :  { %v483_v24 = vadd.f32 %v735_v23, %v642_v60  ;;  %v477_v25 = vpop.f32.mrb[11].mxu1  ;;  %v506_v27 = vmul.f32 %v651_v1, %v491_v21 }
 0x1c9   :  { %v478_v28 = vadd.f32 %v642_v60, %v477_v25  ;;  %516 = vadd.xlane.f32.xlu1 %v515_v26  ;;  %v505_v29 = vmul.f32 %v651_v1, %v490_v22 }
 0x1ca   :  { %v493_v30 = vmax.f32 %v483_v24, 0.0  ;;  %v524_v33 = vsel %vm356_vm4, %v506_v27, 0.0 }
 0x1cb   :  { %v492_v31 = vmax.f32 %v478_v28, 0.0  ;;  %v521_v32 = vsel %vm356_vm4, %v505_v29, 0.0 }
 0x1cc   :  { %522 = vadd.xlane.f32.xlu0 %v521_v32  ;;  %v508_v34 = vmul.f32 %v651_v1, %v493_v30 }
 0x1cd   :  { %525 = vadd.xlane.f32.xlu1 %v524_v33  ;;  %v507_v35 = vmul.f32 %v651_v1, %v492_v31  ;;  %v588_v1 = vsub.s32 %v585_v54, %v554_v41 }
 0x1ce   :  { %v530_v37 = vsel %vm356_vm4, %v508_v34, 0.0 }
 0x1cf   :  { %v527_v36 = vsel %vm356_vm4, %v507_v35, 0.0 }
 0x1d0   :  { %528 = vadd.xlane.f32.xlu0 %v527_v36 }
 0x1d1   :  { %531 = vadd.xlane.f32.xlu1 %v530_v37 }
 0x24e   :  { %v514_v40 = vpop.xlane.xlu0 %513 }
 0x24f   :  { %v536_v51 = vadd.f32 %v534_v43, %v514_v40 }
 0x251   :  { %v561_v60 = vrot.slane %v536_v51, %v560_v50 }
 0x252   :  { %v511_v46 = vpop.xlane.xlu0 %510  ;;  %v520_v48 = vpop.xlane.xlu1 %519 }
 0x253   :  { %v535_v49 = vadd.f32 %v534_v43, %v511_v46  ;;  %v538_v57 = vadd.f32 %v534_v43, %v520_v48 }
 0x255   :  { %v556_v55 = vrot.slane %v535_v49, %v555_v45  ;;  %v575_v4 = vrot.slane %v538_v57, %v574_v56 }
 0x256   :  { %v517_v58 = vpop.xlane.xlu1 %516 }
 0x257   :  { %v537_v59 = vadd.f32 %v534_v43, %v517_v58  ;;  %v563_v3 = vsel %vm562_vm5, %v561_v60, %v556_v55 }
 0x259   :  { %v568_v63 = vrot.slane %v537_v59, %v567_v53  ;;  %v523_v0 = vpop.xlane.xlu0 %522 }
 0x25a   :  { %v539_v5 = vadd.f32 %v534_v43, %v523_v0  ;;  %v526_v6 = vpop.xlane.xlu1 %525 }
 0x25b   :  { %v570_v7 = vsel %vm569_vm6, %v568_v63, %v563_v3  ;;  %v540_v8 = vadd.f32 %v534_v43, %v526_v6 }
 0x25c   :  { %v577_v9 = vsel %vm576_vm7, %v575_v4, %v570_v7  ;;  %v582_v10 = vrot.slane %v539_v5, %v581_v61 }
 0x25d   :  { %v589_v12 = vrot.slane %v540_v8, %v588_v1  ;;  %v529_v13 = vpop.xlane.xlu0 %528 }
 0x25e   :  { %v584_v15 = vsel %vm583_vm8, %v582_v10, %v577_v9  ;;  %v541_v16 = vadd.f32 %v534_v43, %v529_v13  ;;  %v532_v17 = vpop.xlane.xlu1 %531 }
 0x25f   :  { %v542_v18 = vadd.f32 %v534_v43, %v532_v17  ;;  %v591_v20 = vsel %vm590_vm9, %v589_v12, %v584_v15 }
 0x260   :  { %v596_v19 = vrot.slane %v541_v16, %v595_v11 }
 0x261   :  { %v603_v21 = vrot.slane %v542_v18, %v602_v14 }
 0x262   :  { %v598_v22 = vsel %vm597_vm10, %v596_v19, %v591_v20 }
 0x263   :  { %v605_v23 = vsel %vm604_vm11, %v603_v21, %v598_v22 }
 0x264   :  { %608 = vst.msk [vmem:[#allocation3] sm:$0x1] %vm607_vm12, %v605_v23 }
 0x265   :  { %770 = shalt.err (!%p767_p4)
}
 0x266   :  { %s771_s18 = scalar_lea.hbm %s973_s9, 16 }
 0x267   :  { %p772_p5 = scmp.ne.s32.totalorder %s973_s9, %s771_s18  ;;  %p775_p6 = scmp.lt.u32.totalorder %s771_s18, %s973_s9 }
 0x269   :  { %p777_p7 = pnand %p775_p6, %p772_p5 }
 0x26b   :  { %780 = shalt.err (!%p777_p7)
}
 0x26c   :  { %618 = dma.vmem_to_hbm [thread:$0]  %s616_s13, 16, %s973_s9, [#allocation4]  }
 0x26d   :  { %781 = dma.done.wait [#allocation4], 16  }
 0x26e   :  { %782 = vsyncadd [#allocation4], 4294967280 }
 0x26f   :  { %622 = vsyncpa [#allocation4], 1 }

</bundles_post_ra>
